<compile_context>
chip_gen: v6e
topology: v6e:2x2x1
jax: 0.10.0
libtpu: 0.0.40
codegen_flags: <defaults>
</compile_context>

<pallas_src>
import jax
import jax.numpy as jnp
from jax import lax
from jax.experimental import pallas as pl
from jax.experimental.pallas import tpu as pltpu


# ----------------------------------------------------------------------------
# Pallas kernel: normalize over C, apply frequency-filter matmul, denormalize.
# ----------------------------------------------------------------------------
def _freq_decomp_kernel(x_ref, f_ref, o_ref):
    # x_ref block: (tb, C, L); f_ref: (L, L); o_ref block: (tb, C, L)
    x = x_ref[...].astype(jnp.float32)                 # upcast only in VMEM
    tb, c, l = x.shape

    # Per-time-step stats over channels, single pass (sum / sum-of-squares).
    s = jnp.sum(x, axis=1, keepdims=True)              # (tb, 1, L)
    ss = jnp.sum(x * x, axis=1, keepdims=True)         # (tb, 1, L)
    mean = s * (1.0 / c)
    denom = 1.0 / (c - 1) if c > 1 else 1.0            # guard C==1 (torch -> NaN)
    var = (ss - s * mean) * denom + 1e-5                # == sum((x-mean)^2)/(c-1)+eps
    inv_std = lax.rsqrt(var)                            # EUP rsqrt (no sqrt+div)
    std = var * inv_std                                 # sqrt(var), one extra mul

    f = f_ref[...]
    # Fused normalize + matmul-dtype cast (no extra f32 temporary kept live).
    xn = ((x - mean) * inv_std).astype(f.dtype)         # (tb, C, L)

    if c % 8 == 0 and l % 128 == 0:
        # (tb, C) collapse is a pure layout no-op -> one large MXU matmul.
        y = jnp.dot(xn.reshape(tb * c, l), f,
                    preferred_element_type=jnp.float32).reshape(tb, c, l)
        o_ref[...] = (y * std + mean).astype(o_ref.dtype)
    else:
        # Unaligned / short-L case (e.g. C=4, L=16): per-batch 2-D matmuls,
        # no host-side padding, compiler vreg-pads internally.
        for b in range(tb):                              # tb is static
            y = jnp.dot(xn[b], f, preferred_element_type=jnp.float32)
            o_ref[b] = (y * std[b] + mean[b]).astype(o_ref.dtype)


# ----------------------------------------------------------------------------
# Generation-aware tiling helpers.
# ----------------------------------------------------------------------------
def _vmem_capacity_bytes():
    try:
        return int(pltpu.get_tpu_info().vmem_capacity_bytes)
    except Exception:
        return 64 * 1024 * 1024          # conservative (v7x per-core VMEM)


def _pick_block_batch(B, C, L, f_bytes, in_itemsize, out_itemsize,
                      vmem_cap, aligned):
    budget = int(0.375 * vmem_cap)       # ~24 MiB on v7x, ~48 MiB on v5e/v6e
    # double-buffered in + out, ~3 f32 in-kernel temporaries per batch element
    per_b = C * L * (2 * in_itemsize + 2 * out_itemsize + 3 * 4)
    tb = max(1, (budget - 2 * f_bytes) // per_b)
    if not aligned:
        tb = min(tb, 16)                 # bound the unrolled per-batch matmul loop
    if B >= 2:
        tb = min(tb, pl.cdiv(B, 2))      # >=2 grid steps -> both v7x TensorCores
    return int(max(1, min(tb, B)))


# ----------------------------------------------------------------------------
# Wrapper.
# ----------------------------------------------------------------------------
def freq_decomp_moe_pallas(x, filter_matrix, *, block_batch=None,
                           matmul_dtype=jnp.float32):
    """x: (B, C, L), filter_matrix: (L, L) -> (B, C, L) in x.dtype."""
    B, C, L = x.shape
    out_dtype = x.dtype
    in_itemsize = jnp.dtype(x.dtype).itemsize
    out_itemsize = jnp.dtype(out_dtype).itemsize

    f = filter_matrix.astype(matmul_dtype)               # f32 default (accuracy)
    f_bytes = L * L * jnp.dtype(matmul_dtype).itemsize

    aligned = (C % 8 == 0) and (L % 128 == 0)
    vmem_cap = _vmem_capacity_bytes()
    tb = (block_batch if block_batch is not None
          else _pick_block_batch(B, C, L, f_bytes, in_itemsize, out_itemsize,
                                 vmem_cap, aligned))
    tb = int(max(1, min(tb, B)))

    # Estimated per-call VMEM footprint (pipelined buffers + temporaries).
    blk = tb * C * L
    est_vmem = (2 * blk * in_itemsize + 2 * blk * out_itemsize
                + 3 * blk * 4 + 2 * f_bytes + (2 << 20))
    compiler_kwargs = dict(dimension_semantics=("parallel",))
    if est_vmem > 16 * 1024 * 1024:       # only raise above the smallest default
        compiler_kwargs["vmem_limit_bytes"] = int(
            min(est_vmem * 5 // 4, int(0.75 * vmem_cap)))

    def _call(filter_single_buffered):
        if filter_single_buffered:
            # Constant index_map -> fetched once; single buffer halves F's VMEM.
            f_spec = pl.BlockSpec((L, L), lambda b: (0, 0),
                                  pipeline_mode=pl.Buffered(1))
        else:
            f_spec = pl.BlockSpec((L, L), lambda b: (0, 0))
        return pl.pallas_call(
            _freq_decomp_kernel,
            out_shape=jax.ShapeDtypeStruct((B, C, L), out_dtype),
            grid=(pl.cdiv(B, tb),),
            in_specs=[
                # Full trailing dims (C, L): exempt from (8,128) divisibility,
                # so no host-side padding / slicing round trips are needed.
                pl.BlockSpec((tb, C, L), lambda b: (b, 0, 0)),
                f_spec,
            ],
            out_specs=pl.BlockSpec((tb, C, L), lambda b: (b, 0, 0)),
            compiler_params=pltpu.CompilerParams(**compiler_kwargs),
        )(x, f)

    try:
        return _call(True)
    except Exception:
        # Fallback for environments without pipeline_mode / Buffered(1).
        return _call(False)


# ----------------------------------------------------------------------------
# JAX glue: learnable band boundaries / weights -> real (L, L) filter matrix
# equivalent to rfft -> band-mask*weight -> irfft.
# ----------------------------------------------------------------------------
def build_filter_matrix(band_boundaries, band_weights, seq_len):
    freq_len = seq_len // 2 + 1
    b = jnp.sort(jax.nn.sigmoid(band_boundaries))
    b = jnp.concatenate(
        [jnp.zeros((1,), jnp.float32), b, jnp.ones((1,), jnp.float32)])
    idx = (b * freq_len).astype(jnp.int32)              # trunc toward 0 (== .long())
    idx = idx.at[-1].set(freq_len)

    k = jnp.arange(freq_len)
    w = jnp.zeros((freq_len,), jnp.float32)
    for i in range(band_weights.shape[0]):
        in_band = ((k >= idx[i]) & (k < idx[i + 1])).astype(jnp.float32)
        w = w + band_weights[i] * in_band

    eye = jnp.eye(seq_len, dtype=jnp.float32)
    # row i of F = irfft(rfft(e_i) * w)  =>  irfft(rfft(x)*w) == x @ F
    F = jnp.fft.irfft(jnp.fft.rfft(eye, axis=-1) * w[None, :],
                      n=seq_len, axis=-1)
    return jnp.real(F).astype(jnp.float32)


# ----------------------------------------------------------------------------
# Pure-JAX reference (mirrors the PyTorch forward exactly) for validation.
# ----------------------------------------------------------------------------
def reference_forward(x, band_boundaries, band_weights, seq_len):
    B, C, L = x.shape
    xp = jnp.transpose(x, (0, 2, 1))                     # (B, L, C)
    mean = jnp.mean(xp, axis=2, keepdims=True)
    xp = xp - mean
    var = jnp.var(xp, axis=2, keepdims=True, ddof=1) + 1e-5
    xp = xp / jnp.sqrt(var)
    xn = jnp.transpose(xp, (0, 2, 1))                    # (B, C, L)

    fx = jnp.fft.rfft(xn, axis=-1)
    freq_len = L // 2 + 1
    b = jnp.sort(jax.nn.sigmoid(band_boundaries))
    b = jnp.concatenate(
        [jnp.zeros((1,), jnp.float32), b, jnp.ones((1,), jnp.float32)])
    idx = (b * freq_len).astype(jnp.int32)
    idx = idx.at[-1].set(freq_len)
    k = jnp.arange(freq_len)
    comb = jnp.zeros_like(fx)
    for i in range(band_weights.shape[0]):
        m = ((k >= idx[i]) & (k < idx[i + 1])).astype(jnp.float32)
        comb = comb + fx * m * band_weights[i]
    out = jnp.fft.irfft(comb, n=L, axis=-1)              # (B, C, L)

    outp = jnp.transpose(out, (0, 2, 1))                 # (B, L, C)
    outp = outp * jnp.sqrt(var) + mean
    return jnp.transpose(outp, (0, 2, 1))                # (B, C, L)


if __name__ == "__main__":
    # Module config (small shapes, consistent with the module).
    expert_num = 3
    seq_len = 16
    B, C = 2, 4                                          # batch, channels

    key = jax.random.PRNGKey(0)
    kx, kb = jax.random.split(key)

    band_boundaries = jax.random.uniform(
        kb, (expert_num - 1,), dtype=jnp.float32)        # ~ torch.rand init
    # non-uniform weights (torch init is ones) so the band logic is exercised
    band_weights = jnp.array([1.0, 0.6, 0.3], dtype=jnp.float32)

    x = jax.random.normal(kx, (B, C, seq_len), dtype=jnp.float32)

    # fold rfft -> band scaling -> irfft into one real (L, L) matrix (host glue)
    F = build_filter_matrix(band_boundaries, band_weights, seq_len)

    out = jax.block_until_ready(freq_decomp_moe_pallas(x, F))
    ref = reference_forward(x, band_boundaries, band_weights, seq_len)

    assert out.shape == (B, C, seq_len) and out.dtype == x.dtype
    max_err = float(jnp.max(jnp.abs(out - ref)))
    assert jnp.allclose(out, ref, rtol=2e-3, atol=2e-3), f"max abs err {max_err}"

    print("KERNEL_OK")
</pallas_src>

<mosaic_0001>
module attributes {stable_mosaic.version = 11 : i64} {
  func.func @_freq_decomp_kernel(%arg0: i32, %arg1: memref<1x4x16xf32, #tpu.memory_space<vmem>>, %arg2: memref<16x16xf32, #tpu.memory_space<vmem>>, %arg3: memref<1x4x16xf32, #tpu.memory_space<vmem>>) attributes {dimension_semantics = [#tpu.dimension_semantics<parallel>], iteration_bounds = array<i64: 2>, scalar_prefetch = 0 : i64, scratch_operands = 0 : i64, tpu.core_type = #tpu.core_type<tc>, window_params = [{transform_indices = @transform_0, window_bounds = array<i64: 1, 4, 16>}, {pipeline_mode = #tpu.pipeline_mode<synchronous>, transform_indices = @transform_1, window_bounds = array<i64: 16, 16>}, {transform_indices = @transform_2, window_bounds = array<i64: 1, 4, 16>}]} {
    %c0 = arith.constant 0 : index
    %c0_0 = arith.constant 0 : index
    %c0_1 = arith.constant 0 : index
    %0 = vector.load %arg1[%c0, %c0_0, %c0_1] : memref<1x4x16xf32, #tpu.memory_space<vmem>>, vector<1x4x16xf32>
    %cst = arith.constant dense<0.000000e+00> : vector<1x16xf32>
    %1 = vector.multi_reduction <add>, %0, %cst [1] : vector<1x4x16xf32> to vector<1x16xf32>
    %2 = vector.shape_cast %1 : vector<1x16xf32> to vector<1x1x16xf32>
    %3 = arith.mulf %0, %0 : vector<1x4x16xf32>
    %cst_2 = arith.constant dense<0.000000e+00> : vector<1x16xf32>
    %4 = vector.multi_reduction <add>, %3, %cst_2 [1] : vector<1x4x16xf32> to vector<1x16xf32>
    %5 = vector.shape_cast %4 : vector<1x16xf32> to vector<1x1x16xf32>
    %cst_3 = arith.constant 2.500000e-01 : f32
    %6 = vector.broadcast %cst_3 : f32 to vector<1x1x16xf32>
    %7 = arith.mulf %2, %6 : vector<1x1x16xf32>
    %8 = arith.mulf %2, %7 : vector<1x1x16xf32>
    %9 = arith.subf %5, %8 : vector<1x1x16xf32>
    %cst_4 = arith.constant 0.333333343 : f32
    %10 = vector.broadcast %cst_4 : f32 to vector<1x1x16xf32>
    %11 = arith.mulf %9, %10 : vector<1x1x16xf32>
    %cst_5 = arith.constant 9.99999974E-6 : f32
    %12 = vector.broadcast %cst_5 : f32 to vector<1x1x16xf32>
    %13 = arith.addf %11, %12 : vector<1x1x16xf32>
    %14 = math.rsqrt %13 : vector<1x1x16xf32>
    %15 = arith.mulf %13, %14 : vector<1x1x16xf32>
    %c0_6 = arith.constant 0 : index
    %c0_7 = arith.constant 0 : index
    %16 = vector.load %arg2[%c0_6, %c0_7] : memref<16x16xf32, #tpu.memory_space<vmem>>, vector<16x16xf32>
    %17 = vector.broadcast %7 : vector<1x1x16xf32> to vector<1x4x16xf32>
    %18 = arith.subf %0, %17 : vector<1x4x16xf32>
    %19 = vector.broadcast %14 : vector<1x1x16xf32> to vector<1x4x16xf32>
    %20 = arith.mulf %18, %19 : vector<1x4x16xf32>
    %21 = vector.shape_cast %20 : vector<1x4x16xf32> to vector<4x16xf32>
    %cst_8 = arith.constant dense<0.000000e+00> : vector<4x16xf32>
    %22 = tpu.matmul %21, %16, %cst_8 {dimension_numbers = #tpu.dot_dimension_numbers<[1], [0], [0], [1], [0, 0, 1, 1], [], []>} : vector<4x16xf32>, vector<16x16xf32>, vector<4x16xf32> -> vector<4x16xf32>
    %23 = vector.shape_cast %15 : vector<1x1x16xf32> to vector<1x16xf32>
    %24 = vector.broadcast %23 : vector<1x16xf32> to vector<4x16xf32>
    %25 = arith.mulf %22, %24 : vector<4x16xf32>
    %26 = vector.shape_cast %7 : vector<1x1x16xf32> to vector<1x16xf32>
    %27 = vector.broadcast %26 : vector<1x16xf32> to vector<4x16xf32>
    %28 = arith.addf %25, %27 : vector<4x16xf32>
    %c0_9 = arith.constant 0 : index
    %c0_10 = arith.constant 0 : index
    %c0_11 = arith.constant 0 : index
    %29 = vector.load %arg3[%c0_9, %c0_10, %c0_11] : memref<1x4x16xf32, #tpu.memory_space<vmem>>, vector<1x4x16xf32>
    %30 = vector.shape_cast %29 : vector<1x4x16xf32> to vector<4x16xf32>
    %31 = vector.shape_cast %28 : vector<4x16xf32> to vector<1x4x16xf32>
    tpu.vector_store %arg3[%c0_9, %c0_10, %c0_11], %31 {strides = array<i32>} : memref<1x4x16xf32, #tpu.memory_space<vmem>>, vector<1x4x16xf32>,
    return
  }
  func.func @transform_0(%arg0: i32) -> (i32, i32, i32) {
    %c0_i32 = arith.constant 0 : i32
    %c0_i32_0 = arith.constant 0 : i32
    %c0_i32_1 = arith.constant 0 : i32
    return %arg0, %c0_i32, %c0_i32_0 : i32, i32, i32
  }
  func.func @transform_1(%arg0: i32) -> (i32, i32) {
    %c0_i32 = arith.constant 0 : i32
    %c0_i32_0 = arith.constant 0 : i32
    %c0_i32_1 = arith.constant 0 : i32
    return %c0_i32, %c0_i32_0 : i32, i32
  }
  func.func @transform_2(%arg0: i32) -> (i32, i32, i32) {
    %c0_i32 = arith.constant 0 : i32
    %c0_i32_0 = arith.constant 0 : i32
    %c0_i32_1 = arith.constant 0 : i32
    return %arg0, %c0_i32, %c0_i32_0 : i32, i32, i32
  }
}

module attributes {stable_mosaic.version = 11 : i64} {
  func.func @_freq_decomp_kernel(%arg0: i32, %arg1: memref<1x4x16xf32, #tpu.memory_space<vmem>>, %arg2: memref<16x16xf32, #tpu.memory_space<vmem>>, %arg3: memref<1x4x16xf32, #tpu.memory_space<vmem>>) attributes {dimension_semantics = [#tpu.dimension_semantics<parallel>], iteration_bounds = array<i64: 2>, scalar_prefetch = 0 : i64, scratch_operands = 0 : i64, tpu.core_type = #tpu.core_type<tc>, window_params = [{transform_indices = @transform_0, window_bounds = array<i64: 1, 4, 16>}, {pipeline_mode = #tpu.pipeline_mode<synchronous>, transform_indices = @transform_1, window_bounds = array<i64: 16, 16>}, {transform_indices = @transform_2, window_bounds = array<i64: 1, 4, 16>}]} {
    %c0 = arith.constant 0 : index
    %c0_0 = arith.constant 0 : index
    %c0_1 = arith.constant 0 : index
    %0 = vector.load %arg1[%c0, %c0_0, %c0_1] : memref<1x4x16xf32, #tpu.memory_space<vmem>>, vector<1x4x16xf32>
    %cst = arith.constant dense<0.000000e+00> : vector<1x16xf32>
    %1 = vector.multi_reduction <add>, %0, %cst [1] : vector<1x4x16xf32> to vector<1x16xf32>
    %2 = vector.shape_cast %1 : vector<1x16xf32> to vector<1x1x16xf32>
    %3 = arith.mulf %0, %0 : vector<1x4x16xf32>
    %cst_2 = arith.constant dense<0.000000e+00> : vector<1x16xf32>
    %4 = vector.multi_reduction <add>, %3, %cst_2 [1] : vector<1x4x16xf32> to vector<1x16xf32>
    %5 = vector.shape_cast %4 : vector<1x16xf32> to vector<1x1x16xf32>
    %cst_3 = arith.constant 2.500000e-01 : f32
    %6 = vector.broadcast %cst_3 : f32 to vector<1x1x16xf32>
    %7 = arith.mulf %2, %6 : vector<1x1x16xf32>
    %8 = arith.mulf %2, %7 : vector<1x1x16xf32>
    %9 = arith.subf %5, %8 : vector<1x1x16xf32>
    %cst_4 = arith.constant 0.333333343 : f32
    %10 = vector.broadcast %cst_4 : f32 to vector<1x1x16xf32>
    %11 = arith.mulf %9, %10 : vector<1x1x16xf32>
    %cst_5 = arith.constant 9.99999974E-6 : f32
    %12 = vector.broadcast %cst_5 : f32 to vector<1x1x16xf32>
    %13 = arith.addf %11, %12 : vector<1x1x16xf32>
    %14 = math.rsqrt %13 : vector<1x1x16xf32>
    %15 = arith.mulf %13, %14 : vector<1x1x16xf32>
    %c0_6 = arith.constant 0 : index
    %c0_7 = arith.constant 0 : index
    %16 = vector.load %arg2[%c0_6, %c0_7] : memref<16x16xf32, #tpu.memory_space<vmem>>, vector<16x16xf32>
    %17 = vector.broadcast %7 : vector<1x1x16xf32> to vector<1x4x16xf32>
    %18 = arith.subf %0, %17 : vector<1x4x16xf32>
    %19 = vector.broadcast %14 : vector<1x1x16xf32> to vector<1x4x16xf32>
    %20 = arith.mulf %18, %19 : vector<1x4x16xf32>
    %21 = vector.shape_cast %20 : vector<1x4x16xf32> to vector<4x16xf32>
    %cst_8 = arith.constant dense<0.000000e+00> : vector<4x16xf32>
    %22 = tpu.matmul %21, %16, %cst_8 {dimension_numbers = #tpu.dot_dimension_numbers<[1], [0], [0], [1], [0, 0, 1, 1], [], []>} : vector<4x16xf32>, vector<16x16xf32>, vector<4x16xf32> -> vector<4x16xf32>
    %23 = vector.shape_cast %15 : vector<1x1x16xf32> to vector<1x16xf32>
    %24 = vector.broadcast %23 : vector<1x16xf32> to vector<4x16xf32>
    %25 = arith.mulf %22, %24 : vector<4x16xf32>
    %26 = vector.shape_cast %7 : vector<1x1x16xf32> to vector<1x16xf32>
    %27 = vector.broadcast %26 : vector<1x16xf32> to vector<4x16xf32>
    %28 = arith.addf %25, %27 : vector<4x16xf32>
    %c0_9 = arith.constant 0 : index
    %c0_10 = arith.constant 0 : index
    %c0_11 = arith.constant 0 : index
    %29 = vector.load %arg3[%c0_9, %c0_10, %c0_11] : memref<1x4x16xf32, #tpu.memory_space<vmem>>, vector<1x4x16xf32>
    %30 = vector.shape_cast %29 : vector<1x4x16xf32> to vector<4x16xf32>
    %31 = vector.shape_cast %28 : vector<4x16xf32> to vector<1x4x16xf32>
    tpu.vector_store %arg3[%c0_9, %c0_10, %c0_11], %31 {strides = array<i32>} : memref<1x4x16xf32, #tpu.memory_space<vmem>>, vector<1x4x16xf32>,
    return
  }
  func.func @transform_0(%arg0: i32) -> (i32, i32, i32) {
    %c0_i32 = arith.constant 0 : i32
    %c0_i32_0 = arith.constant 0 : i32
    %c0_i32_1 = arith.constant 0 : i32
    return %arg0, %c0_i32, %c0_i32_0 : i32, i32, i32
  }
  func.func @transform_1(%arg0: i32) -> (i32, i32) {
    %c0_i32 = arith.constant 0 : i32
    %c0_i32_0 = arith.constant 0 : i32
    %c0_i32_1 = arith.constant 0 : i32
    return %c0_i32, %c0_i32_0 : i32, i32
  }
  func.func @transform_2(%arg0: i32) -> (i32, i32, i32) {
    %c0_i32 = arith.constant 0 : i32
    %c0_i32_0 = arith.constant 0 : i32
    %c0_i32_1 = arith.constant 0 : i32
    return %arg0, %c0_i32, %c0_i32_0 : i32, i32, i32
  }
}

</mosaic_0001>

<bundles_post_ra>
// kernel: tpu_custom_call.1
= control target key start
LH: loop header
LB: loop body
LE: loop exit
PB: predicated region body
PF: predicated region fallthrough
CT: control target
= control target key end

     0   :  { %7 = vsyncpa [#allocation3], 0  ;;  %s768_s0 = inlined_call_operand.hbm [shape: f32[2,4,16], index: 0, kind: input, shape index: {}]   ;;  %s769_s1 = inlined_call_operand.hbm [shape: f32[16,16], index: 1, kind: input, shape index: {}]   ;;  %s770_s2 = inlined_call_operand.hbm [shape: f32[2,4,16], index: 2, kind: output, shape index: {}]  }
   0x1   :  { %9 = vsyncpa [#allocation3 + $0x1], 0 }
   0x2   :  { %10 = vsyncpa [#allocation6], 0 }
   0x3   :  { %11 = vsyncpa [#allocation4], 0 }
   0x4   :  { %13 = vsyncpa [#allocation4 + $0x1], 0  ;;  %s607_s9 = smov 0   ;;  %s609_s10 = smov 0  }
   0x5   :  { %s611_s11 = smov 0   ;;  %s613_s12 = smov 0  }
   0x6 LB: > { %s628_s13 = sadd.s32 4294967295, %s583_s12   ;;  %s373_s14 = sadd.s32 4294967294, %s583_s12   ;;  %s583_s12 = sphi %s613_s12, %s792_s12   ;;  %s579_s11 = sphi %s611_s11, %s791_s11   ;;  %s575_s10 = sphi %s609_s10, %s790_s10   ;;  %s571_s9 = sphi %s607_s9, %s789_s9  }
   0x7   : > { %p39_p0 = scmp.ne.s32.totalorder %s575_s10, %s571_s9  ;;  %p771_p1 = scmp.eq.s32.totalorder %s628_s13, 0 }
   0x8   : > { %p90_p3 = scmp.eq.s32.totalorder %s373_s14, 1  ;;  %p374_p5 = scmp.ge.s32.totalorder %s583_s12, 1 }
   0x9   : > { %p637_p4 = por %p771_p1, %p39_p0  ;;  %p97_p7 = scmp.lt.s32.totalorder %s583_s12, 3 }
   0xa   : > { %p642_p6 = por %p90_p3, %p39_p0  ;;  %s585_s18 = smov [#allocation5]  }
   0xb   : > { %s775_s15 = scalar_select %p637_p4, 1, 0 }
   0xc   : > { %s776_s16 = scalar_select %p642_p6, 1, 0 }
   0xd   : > { %p647_p8 = pnand %p374_p5, %p97_p7  ;;  %s109_s19 = sshll.u32 %s585_s18, 4  ;;  %s110_s19 = int_to_ptr.vmem [resolvable:$true] %s109_s19 }
   0xe   : > { %s661_s21 = sadd.s32 1, %s583_s12   ;;  %s26_s22 = sadd.s32 1, %s579_s11 }
   0xf   : > { %s777_s17 = scalar_select %p647_p8, 1, 0 }
  0x10   : > { %p406_p9 = pneg %p647_p8  ;;  %s23_s23 = ssub.s32 %s583_s12, %s661_s21 }
  0x11   : > { %s472_s24 = scalar_lea.vmem %s110_s19, 256  ;;  %p480_p5 = scmp.lt.s32.totalorder %s110_s19, %s110_s19 }
  0x12   : > { %p656_p11 = pnand %p406_p9, %p771_p1  ;;  %p473_p13 = scmp.ne.s32.totalorder %s110_s19, %s472_s24 }
  0x13   : > { %p481_p7 = scmp.lt.s32.totalorder %s472_s24, %s472_s24 }
  0x14   : > { %p463_p12 = pneg %p656_p11 }
  0x15   : > { %p482_p10 = por %p481_p7, %p480_p5 }
  0x16   : > { %p475_p0 = pnand %p473_p13, %p463_p12 }
  0x18   : > { %p476_p3 = pneg %p475_p0 }
  0x1a   : > { %p483_p2 = pnand %p482_p10, %p476_p3 }
  0x1c   : > { %486 = shalt.err (!%p483_p2)
}
  0x1d   : > { %s586_s25 = smov 128   ;;  %s587_s26 = smov 8  }
  0x1e   : > { %409 = dma.hbm_to_vmem [thread:$0]  (!%p656_p11), %s769_s1, 256, %s110_s19, [#allocation6], %s586_s25, %s586_s25, %s587_s26  }
  0x1f   : > { %p24_p9 = scmp.eq.s32.totalorder %s23_s23, 0  ;;  %p33_p12 = scmp.ne.s32.totalorder %s579_s11, %s575_s10 }
  0x20   : > { %p34_p10 = scmp.eq.s32.totalorder %s583_s12, 0  ;;  %p419_p2 = scmp.lt.s32.totalorder %s583_s12, 2 }
  0x21   : > { %s678_s29 = scalar_select %p24_p9, %s579_s11, %s26_s22  }
  0x22   : > { %p35_p13 = por %p34_p10, %p33_p12  ;;  %p779_p0 = scmp.eq.s32.totalorder %s628_s13, 1 }
  0x23   : > { %s123_s3 = sand.u32 1, %s579_s11   ;;  %s378_s4 = sshll.u32 %s583_s12, 6 }
  0x24   : > { %p682_p3 = por %p779_p0, %p33_p12  ;;  %s377_s5 = sshll.u32 %s123_s3, 2 }
  0x25   : > { %s691_s8 = scalar_lea.hbm %s768_s0, %s378_s4  ;;  %s127_s14 = scalar_lea.vmem [#allocation2], %s377_s5 }
  0x26   : > { %s780_s30 = scalar_select %p682_p3, 1, 0 }
  0x27   : > { %s134_s18 = sshll.u32 %s127_s14, 4  ;;  %p693_p11 = pnand %p419_p2, %p35_p13  ;;  %s135_s18 = int_to_ptr.vmem [resolvable:$true] %s134_s18 }
  0x28   : > { %s124_s20 = scalar_lea.sflag [#allocation3], %s123_s3  ;;  %s487_s22 = scalar_lea.hbm %s691_s8, 64 }
  0x29   : > { %p488_p5 = scmp.ne.s32.totalorder %s691_s8, %s487_s22  ;;  %p489_p7 = pneg %p693_p11 }
  0x2a   : > { %s492_s25 = scalar_lea.hbm %s768_s0, 128  ;;  %p493_p10 = scmp.lt.s32.totalorder %s691_s8, %s768_s0 }
  0x2b   : > { %p490_p9 = pnand %p489_p7, %p488_p5  ;;  %p494_p2 = scmp.lt.s32.totalorder %s492_s25, %s487_s22 }
  0x2d   : > { %p491_p12 = pneg %p490_p9  ;;  %p495_p13 = por %p494_p2, %p493_p10 }
  0x2f   : > { %p496_p0 = pnand %p495_p13, %p491_p12 }
  0x31   : > { %499 = shalt.err (!%p496_p0)
}
  0x32   : > { %s500_s28 = scalar_lea.vmem %s135_s18, 64  ;;  %s588_s3 = smov [#allocation2]  }
  0x33   : > { %p501_p1 = scmp.ne.s32.totalorder %s135_s18, %s500_s28  ;;  %s505_s4 = sshll.u32 %s588_s3, 4  ;;  %s506_s4 = int_to_ptr.vmem [resolvable:$false] %s505_s4 }
  0x34   : > { %s507_s5 = scalar_lea.vmem %s506_s4, 128  ;;  %p508_p5 = scmp.lt.s32.totalorder %s135_s18, %s506_s4 }
  0x35   : > { %p503_p6 = pnand %p501_p1, %p489_p7  ;;  %p509_p9 = scmp.lt.s32.totalorder %s507_s5, %s500_s28 }
  0x37   : > { %p504_p3 = pneg %p503_p6  ;;  %p510_p4 = por %p509_p9, %p508_p5 }
  0x39   : > { %p511_p8 = pnand %p510_p4, %p504_p3 }
  0x3b   : > { %514 = shalt.err (!%p511_p8)
}
  0x3c   : > { %413 = dma.hbm_to_vmem [thread:$0]  (!%p693_p11), %s691_s8, 64, %s135_s18, %s124_s20  }
  0x3d   : > { %p782_p12 = scmp.ne.s32.totalorder %s777_s17, 0 }
  0x3e   : > { %s714_s6 = sand.u32 (!%p782_p12), 1, %s575_s10   ;;  %p783_p1 = scmp.ne.s32.totalorder (!%p782_p12), %s775_s15, 0 }
  0x3f   : > { %143 = sbr.rel (%p782_p12) target bundleno = 323 (0x143), region = 28  ;;  %s380_s7 = sshll.u32 (!%p782_p12), %s714_s6, 2 }
  0x40   : > { %s146_s14 = scalar_lea.sflag (!%p782_p12), [#allocation3], %s714_s6  ;;  %s149_s22 = scalar_lea.vmem (!%p782_p12), [#allocation2], %s380_s7 }
  0x44   : > { %558 = dma.done.wait (%p783_p1), %s146_s14, 64  }
  0x45   : > { %560 = vsyncadd (%p783_p1), %s146_s14, 4294967232  ;;  %p784_p4 = scmp.eq.s32.totalorder %s628_s13, 0 }
  0x47   : > { %562 = dma.done.wait (%p784_p4), [#allocation6], 256   ;;  %p785_p6 = pmov %p784_p4 }
  0x48   : > { %v589_v0 = vmov 0.0   ;;  %vm590_vm0 = vmmov 0   ;;  %vm175_vm1 = vcmask 125952   ;;  %v199_v1 = vld [vmem:[#allocation5 + $0x8] sm:$0xff]  ;;  %v198_v2 = vld [vmem:[#allocation5] sm:$0xff]  ;;  %vm202_vm2 = vcmask 130048  }
  0x49   : > { %564 = vsyncadd (%p785_p6), [#allocation6], 4294967040  ;;  %391 = vmatprep.subr.mxu0 %v589_v0  ;;  %395 = vmatprep.mubr.msk.f32.mxu0 %vm590_vm0, %v589_v0  ;;  %v174_v3 = vld [vmem:[%s149_s22] sm:$0xf]  ;;  %s385_s15 = sshll.u32 %s628_s13, 6  ;;  %s173_s17 = scalar_lea.vmem [#allocation7], %s380_s7 }
  0x4a   : > { %392 = vmatpush3.msra.mxu0 %v199_v1  ;;  %v176_v4 = vsel %vm175_vm1, %v174_v3, 0.0  ;;  %v183_v5 = vmul.f32 %v174_v3, %v174_v3  ;;  %s293_s8 = sshll.u32 %s173_s17, 4  ;;  %s291_s20 = scalar_lea.hbm %s770_s2, %s385_s15  ;;  %s294_s8 = int_to_ptr.vmem [resolvable:$true] %s293_s8 }
  0x4b   : > { %393 = vmatprep.subr.mxu0 %v589_v0  ;;  %v177_v6 = vrot.slane %v176_v4, 4  ;;  %s280_s23 = scalar_lea.sflag [#allocation4], %s714_s6  ;;  %s515_s24 = scalar_lea.vmem %s294_s8, 64 }
  0x4c   : > { %394 = vmatpush3.msra.mxu0 %v198_v2  ;;  %v184_v7 = vsel %vm175_vm1, %v183_v5, 0.0  ;;  %p516_p8 = scmp.ne.s32.totalorder %s294_s8, %s515_s24  ;;  %p786_p3 = scmp.ne.s32.totalorder %s780_s30, 0 }
  0x4d   : > { %v178_v8 = vadd.f32 %v177_v6, %v176_v4  ;;  %v185_v9 = vrot.slane %v184_v7, 4  ;;  %s591_s13 = smov [#allocation7]  }
  0x4e   : > { %p517_p11 = pnand %p516_p8, %p786_p3  ;;  %s519_s25 = sshll.u32 %s591_s13, 4  ;;  %s520_s25 = int_to_ptr.vmem [resolvable:$false] %s519_s25 }
  0x4f   : > { %v179_v10 = vrot.slane %v178_v8, 2  ;;  %v186_v11 = vadd.f32 %v185_v9, %v184_v7  ;;  %s521_s26 = scalar_lea.vmem %s520_s25, 128  ;;  %p522_p10 = scmp.lt.s32.totalorder %s294_s8, %s520_s25 }
  0x50   : > { %p518_p7 = pneg %p517_p11  ;;  %p523_p2 = scmp.lt.s32.totalorder %s521_s26, %s515_s24 }
  0x51   : > { %v180_v12 = vadd.f32 %v179_v10, %v178_v8  ;;  %v187_v13 = vrot.slane %v186_v11, 2 }
  0x52   : > { %p524_p13 = por %p523_p2, %p522_p10 }
  0x53   : > { %v181_v14 = vrot.slane %v180_v12, 1  ;;  %v188_v15 = vadd.f32 %v187_v13, %v186_v11 }
  0x54   : > { %p525_p0 = pnand %p524_p13, %p518_p7 }
  0x55   : > { %v182_v16 = vadd.f32 %v181_v14, %v180_v12  ;;  %v189_v17 = vrot.slane %v188_v15, 1 }
  0x57   : > { %v190_v18 = vadd.f32 %v189_v17, %v188_v15  ;;  %v191_v19 = vmul.f32 0.25, %v182_v16 }
  0x59   : > { %v192_v20 = vmul.f32 %v191_v19, %v182_v16  ;;  %v200_v24 = vsub.f32 %v174_v3, %v191_v19 }
  0x5b   : > { %v193_v21 = vsub.f32 %v190_v18, %v192_v20 }
  0x5d   : > { %v194_v22 = vmul.f32 0.33333334, %v193_v21 }
  0x5f   : > { %v195_v23 = vadd.f32 1e-05, %v194_v22 }
  0x61   : > { %459 = vrsqrt.f32 %v195_v23 }
  0x6e   : > { %v460_v25 = vpop.eup %459 }
  0x6f   : > { %v201_v26 = vmul.f32 %v460_v25, %v200_v24  ;;  %v197_v27 = vmul.f32 %v460_v25, %v195_v23 }
  0x71   : > { %396 = vmatmul.mubr.msk.f32.vlgmr.msra.gmra.mxu0 %vm202_vm2, %v201_v26 }
 0x131   : > { %v272_v28 = vpop.f32.mrf.mxu0 }
 0x132   : > { %v276_v29 = vmul.f32 %v272_v28, %v197_v27 }
 0x133   : > { %v397_v30 = vpop.f32.mrf.mxu0 }
 0x134   : > { %v277_v31 = vadd.f32 %v276_v29, %v191_v19 }
 0x136   : > { %278 = vst.msk [vmem:[%s173_s17] sm:$0xf] %vm175_vm1, %v277_v31 }
 0x137   : > { %528 = shalt.err (!%p525_p0)
}
 0x138   : > { %s529_s27 = scalar_lea.hbm %s291_s20, 64  ;;  %s533_s4 = scalar_lea.hbm %s770_s2, 128 }
 0x139   : > { %p530_p5 = scmp.ne.s32.totalorder %s291_s20, %s529_s27  ;;  %p534_p1 = scmp.lt.s32.totalorder %s291_s20, %s770_s2 }
 0x13a   : > { %p535_p4 = scmp.lt.s32.totalorder %s533_s4, %s529_s27 }
 0x13b   : > { %p531_p9 = pnand %p530_p5, %p786_p3 }
 0x13c   : > { %p536_p6 = por %p535_p4, %p534_p1 }
 0x13d   : > { %p532_p12 = pneg %p531_p9 }
 0x13f   : > { %p537_p8 = pnand %p536_p6, %p532_p12 }
 0x141   : > { %540 = shalt.err (!%p537_p8)
}
 0x142   : > { %404 = dma.vmem_to_hbm [thread:$0]  (%p786_p3), %s294_s8, 64, %s291_s20, %s280_s23  }
 0x143 PF: > { %s305_s7 = sand.u32 1, %s571_s9   ;;  %p787_p11 = scmp.ne.s32.totalorder %s776_s16, 0 }
 0x144   : > { %p788_p7 = scmp.ge.s32.totalorder %s583_s12, 2  ;;  %s306_s14 = scalar_lea.sflag [#allocation4], %s305_s7 }
 0x146   : > { %p415_p10 = pnand %p788_p7, %p787_p11 }
 0x148   : > { %p416_p2 = pneg %p415_p10 }
 0x14a   : > { %566 = dma.done.wait (%p416_p2), %s306_s14, 64  }
 0x14b   : > { %568 = vsyncadd (%p416_p2), %s306_s14, 4294967232  ;;  %p16_p13 = scmp.ge.s32.totalorder %s661_s21, 4   ;;  %s789_s9 = smov %s575_s10 }
 0x14c   : > { %s790_s10 = smov %s579_s11  ;;  %s791_s11 = smov %s678_s29 }
 0x14d   : > { %s792_s12 = smov %s661_s21  ;;  %18 = sbr.rel (!%p16_p13) target bundleno = 6 (0x6), region = 77 }
 0x152   :  { %311 = vsyncpa [#allocation3], 1 }
 0x153   :  { %313 = vsyncpa [#allocation3 + $0x1], 1 }
 0x154   :  { %314 = vsyncpa [#allocation6], 1 }
 0x155   :  { %315 = vsyncpa [#allocation4], 1 }
 0x156   :  { %317 = vsyncpa [#allocation4 + $0x1], 1 }

// kernel: tpu_custom_call.1
= control target key start
LH: loop header
LB: loop body
LE: loop exit
PB: predicated region body
PF: predicated region fallthrough
CT: control target
= control target key end

     0   :  { %7 = vsyncpa [#allocation3], 0  ;;  %s768_s0 = inlined_call_operand.hbm [shape: f32[2,4,16], index: 0, kind: input, shape index: {}]   ;;  %s769_s1 = inlined_call_operand.hbm [shape: f32[16,16], index: 1, kind: input, shape index: {}]   ;;  %s770_s2 = inlined_call_operand.hbm [shape: f32[2,4,16], index: 2, kind: output, shape index: {}]  }
   0x1   :  { %9 = vsyncpa [#allocation3 + $0x1], 0 }
   0x2   :  { %10 = vsyncpa [#allocation6], 0 }
   0x3   :  { %11 = vsyncpa [#allocation4], 0 }
   0x4   :  { %13 = vsyncpa [#allocation4 + $0x1], 0  ;;  %s607_s9 = smov 0   ;;  %s609_s10 = smov 0  }
   0x5   :  { %s611_s11 = smov 0   ;;  %s613_s12 = smov 0  }
   0x6 LB: > { %s628_s13 = sadd.s32 4294967295, %s583_s12   ;;  %s373_s14 = sadd.s32 4294967294, %s583_s12   ;;  %s583_s12 = sphi %s613_s12, %s792_s12   ;;  %s579_s11 = sphi %s611_s11, %s791_s11   ;;  %s575_s10 = sphi %s609_s10, %s790_s10   ;;  %s571_s9 = sphi %s607_s9, %s789_s9  }
   0x7   : > { %p39_p0 = scmp.ne.s32.totalorder %s575_s10, %s571_s9  ;;  %p771_p1 = scmp.eq.s32.totalorder %s628_s13, 0 }
   0x8   : > { %p90_p3 = scmp.eq.s32.totalorder %s373_s14, 1  ;;  %p374_p5 = scmp.ge.s32.totalorder %s583_s12, 1 }
   0x9   : > { %p637_p4 = por %p771_p1, %p39_p0  ;;  %p97_p7 = scmp.lt.s32.totalorder %s583_s12, 3 }
   0xa   : > { %p642_p6 = por %p90_p3, %p39_p0  ;;  %s585_s18 = smov [#allocation5]  }
   0xb   : > { %s775_s15 = scalar_select %p637_p4, 1, 0 }
   0xc   : > { %s776_s16 = scalar_select %p642_p6, 1, 0 }
   0xd   : > { %p647_p8 = pnand %p374_p5, %p97_p7  ;;  %s109_s19 = sshll.u32 %s585_s18, 4  ;;  %s110_s19 = int_to_ptr.vmem [resolvable:$true] %s109_s19 }
   0xe   : > { %s661_s21 = sadd.s32 1, %s583_s12   ;;  %s26_s22 = sadd.s32 1, %s579_s11 }
   0xf   : > { %s777_s17 = scalar_select %p647_p8, 1, 0 }
  0x10   : > { %p406_p9 = pneg %p647_p8  ;;  %s23_s23 = ssub.s32 %s583_s12, %s661_s21 }
  0x11   : > { %s472_s24 = scalar_lea.vmem %s110_s19, 256  ;;  %p480_p5 = scmp.lt.s32.totalorder %s110_s19, %s110_s19 }
  0x12   : > { %p656_p11 = pnand %p406_p9, %p771_p1  ;;  %p473_p13 = scmp.ne.s32.totalorder %s110_s19, %s472_s24 }
  0x13   : > { %p481_p7 = scmp.lt.s32.totalorder %s472_s24, %s472_s24 }
  0x14   : > { %p463_p12 = pneg %p656_p11 }
  0x15   : > { %p482_p10 = por %p481_p7, %p480_p5 }
  0x16   : > { %p475_p0 = pnand %p473_p13, %p463_p12 }
  0x18   : > { %p476_p3 = pneg %p475_p0 }
  0x1a   : > { %p483_p2 = pnand %p482_p10, %p476_p3 }
  0x1c   : > { %486 = shalt.err (!%p483_p2)
}
  0x1d   : > { %s586_s25 = smov 128   ;;  %s587_s26 = smov 8  }
  0x1e   : > { %409 = dma.hbm_to_vmem [thread:$0]  (!%p656_p11), %s769_s1, 256, %s110_s19, [#allocation6], %s586_s25, %s586_s25, %s587_s26  }
  0x1f   : > { %p24_p9 = scmp.eq.s32.totalorder %s23_s23, 0  ;;  %p33_p12 = scmp.ne.s32.totalorder %s579_s11, %s575_s10 }
  0x20   : > { %p34_p10 = scmp.eq.s32.totalorder %s583_s12, 0  ;;  %p419_p2 = scmp.lt.s32.totalorder %s583_s12, 2 }
  0x21   : > { %s678_s29 = scalar_select %p24_p9, %s579_s11, %s26_s22  }
  0x22   : > { %p35_p13 = por %p34_p10, %p33_p12  ;;  %p779_p0 = scmp.eq.s32.totalorder %s628_s13, 1 }
  0x23   : > { %s123_s3 = sand.u32 1, %s579_s11   ;;  %s378_s4 = sshll.u32 %s583_s12, 6 }
  0x24   : > { %p682_p3 = por %p779_p0, %p33_p12  ;;  %s377_s5 = sshll.u32 %s123_s3, 2 }
  0x25   : > { %s691_s8 = scalar_lea.hbm %s768_s0, %s378_s4  ;;  %s127_s14 = scalar_lea.vmem [#allocation2], %s377_s5 }
  0x26   : > { %s780_s30 = scalar_select %p682_p3, 1, 0 }
  0x27   : > { %s134_s18 = sshll.u32 %s127_s14, 4  ;;  %p693_p11 = pnand %p419_p2, %p35_p13  ;;  %s135_s18 = int_to_ptr.vmem [resolvable:$true] %s134_s18 }
  0x28   : > { %s124_s20 = scalar_lea.sflag [#allocation3], %s123_s3  ;;  %s487_s22 = scalar_lea.hbm %s691_s8, 64 }
  0x29   : > { %p488_p5 = scmp.ne.s32.totalorder %s691_s8, %s487_s22  ;;  %p489_p7 = pneg %p693_p11 }
  0x2a   : > { %s492_s25 = scalar_lea.hbm %s768_s0, 128  ;;  %p493_p10 = scmp.lt.s32.totalorder %s691_s8, %s768_s0 }
  0x2b   : > { %p490_p9 = pnand %p489_p7, %p488_p5  ;;  %p494_p2 = scmp.lt.s32.totalorder %s492_s25, %s487_s22 }
  0x2d   : > { %p491_p12 = pneg %p490_p9  ;;  %p495_p13 = por %p494_p2, %p493_p10 }
  0x2f   : > { %p496_p0 = pnand %p495_p13, %p491_p12 }
  0x31   : > { %499 = shalt.err (!%p496_p0)
}
  0x32   : > { %s500_s28 = scalar_lea.vmem %s135_s18, 64  ;;  %s588_s3 = smov [#allocation2]  }
  0x33   : > { %p501_p1 = scmp.ne.s32.totalorder %s135_s18, %s500_s28  ;;  %s505_s4 = sshll.u32 %s588_s3, 4  ;;  %s506_s4 = int_to_ptr.vmem [resolvable:$false] %s505_s4 }
  0x34   : > { %s507_s5 = scalar_lea.vmem %s506_s4, 128  ;;  %p508_p5 = scmp.lt.s32.totalorder %s135_s18, %s506_s4 }
  0x35   : > { %p503_p6 = pnand %p501_p1, %p489_p7  ;;  %p509_p9 = scmp.lt.s32.totalorder %s507_s5, %s500_s28 }
  0x37   : > { %p504_p3 = pneg %p503_p6  ;;  %p510_p4 = por %p509_p9, %p508_p5 }
  0x39   : > { %p511_p8 = pnand %p510_p4, %p504_p3 }
  0x3b   : > { %514 = shalt.err (!%p511_p8)
}
  0x3c   : > { %413 = dma.hbm_to_vmem [thread:$0]  (!%p693_p11), %s691_s8, 64, %s135_s18, %s124_s20  }
  0x3d   : > { %p782_p12 = scmp.ne.s32.totalorder %s777_s17, 0 }
  0x3e   : > { %s714_s6 = sand.u32 (!%p782_p12), 1, %s575_s10   ;;  %p783_p1 = scmp.ne.s32.totalorder (!%p782_p12), %s775_s15, 0 }
  0x3f   : > { %143 = sbr.rel (%p782_p12) target bundleno = 323 (0x143), region = 28  ;;  %s380_s7 = sshll.u32 (!%p782_p12), %s714_s6, 2 }
  0x40   : > { %s146_s14 = scalar_lea.sflag (!%p782_p12), [#allocation3], %s714_s6  ;;  %s149_s22 = scalar_lea.vmem (!%p782_p12), [#allocation2], %s380_s7 }
  0x44   : > { %558 = dma.done.wait (%p783_p1), %s146_s14, 64  }
  0x45   : > { %560 = vsyncadd (%p783_p1), %s146_s14, 4294967232  ;;  %p784_p4 = scmp.eq.s32.totalorder %s628_s13, 0 }
  0x47   : > { %562 = dma.done.wait (%p784_p4), [#allocation6], 256   ;;  %p785_p6 = pmov %p784_p4 }
  0x48   : > { %v589_v0 = vmov 0.0   ;;  %vm590_vm0 = vmmov 0   ;;  %vm175_vm1 = vcmask 125952   ;;  %v199_v1 = vld [vmem:[#allocation5 + $0x8] sm:$0xff]  ;;  %v198_v2 = vld [vmem:[#allocation5] sm:$0xff]  ;;  %vm202_vm2 = vcmask 130048  }
  0x49   : > { %564 = vsyncadd (%p785_p6), [#allocation6], 4294967040  ;;  %391 = vmatprep.subr.mxu0 %v589_v0  ;;  %395 = vmatprep.mubr.msk.f32.mxu0 %vm590_vm0, %v589_v0  ;;  %v174_v3 = vld [vmem:[%s149_s22] sm:$0xf]  ;;  %s385_s15 = sshll.u32 %s628_s13, 6  ;;  %s173_s17 = scalar_lea.vmem [#allocation7], %s380_s7 }
  0x4a   : > { %392 = vmatpush3.msra.mxu0 %v199_v1  ;;  %v176_v4 = vsel %vm175_vm1, %v174_v3, 0.0  ;;  %v183_v5 = vmul.f32 %v174_v3, %v174_v3  ;;  %s293_s8 = sshll.u32 %s173_s17, 4  ;;  %s291_s20 = scalar_lea.hbm %s770_s2, %s385_s15  ;;  %s294_s8 = int_to_ptr.vmem [resolvable:$true] %s293_s8 }
  0x4b   : > { %393 = vmatprep.subr.mxu0 %v589_v0  ;;  %v177_v6 = vrot.slane %v176_v4, 4  ;;  %s280_s23 = scalar_lea.sflag [#allocation4], %s714_s6  ;;  %s515_s24 = scalar_lea.vmem %s294_s8, 64 }
  0x4c   : > { %394 = vmatpush3.msra.mxu0 %v198_v2  ;;  %v184_v7 = vsel %vm175_vm1, %v183_v5, 0.0  ;;  %p516_p8 = scmp.ne.s32.totalorder %s294_s8, %s515_s24  ;;  %p786_p3 = scmp.ne.s32.totalorder %s780_s30, 0 }
  0x4d   : > { %v178_v8 = vadd.f32 %v177_v6, %v176_v4  ;;  %v185_v9 = vrot.slane %v184_v7, 4  ;;  %s591_s13 = smov [#allocation7]  }
  0x4e   : > { %p517_p11 = pnand %p516_p8, %p786_p3  ;;  %s519_s25 = sshll.u32 %s591_s13, 4  ;;  %s520_s25 = int_to_ptr.vmem [resolvable:$false] %s519_s25 }
  0x4f   : > { %v179_v10 = vrot.slane %v178_v8, 2  ;;  %v186_v11 = vadd.f32 %v185_v9, %v184_v7  ;;  %s521_s26 = scalar_lea.vmem %s520_s25, 128  ;;  %p522_p10 = scmp.lt.s32.totalorder %s294_s8, %s520_s25 }
  0x50   : > { %p518_p7 = pneg %p517_p11  ;;  %p523_p2 = scmp.lt.s32.totalorder %s521_s26, %s515_s24 }
  0x51   : > { %v180_v12 = vadd.f32 %v179_v10, %v178_v8  ;;  %v187_v13 = vrot.slane %v186_v11, 2 }
  0x52   : > { %p524_p13 = por %p523_p2, %p522_p10 }
  0x53   : > { %v181_v14 = vrot.slane %v180_v12, 1  ;;  %v188_v15 = vadd.f32 %v187_v13, %v186_v11 }
  0x54   : > { %p525_p0 = pnand %p524_p13, %p518_p7 }
  0x55   : > { %v182_v16 = vadd.f32 %v181_v14, %v180_v12  ;;  %v189_v17 = vrot.slane %v188_v15, 1 }
  0x57   : > { %v190_v18 = vadd.f32 %v189_v17, %v188_v15  ;;  %v191_v19 = vmul.f32 0.25, %v182_v16 }
  0x59   : > { %v192_v20 = vmul.f32 %v191_v19, %v182_v16  ;;  %v200_v24 = vsub.f32 %v174_v3, %v191_v19 }
  0x5b   : > { %v193_v21 = vsub.f32 %v190_v18, %v192_v20 }
  0x5d   : > { %v194_v22 = vmul.f32 0.33333334, %v193_v21 }
  0x5f   : > { %v195_v23 = vadd.f32 1e-05, %v194_v22 }
  0x61   : > { %459 = vrsqrt.f32 %v195_v23 }
  0x6e   : > { %v460_v25 = vpop.eup %459 }
  0x6f   : > { %v201_v26 = vmul.f32 %v460_v25, %v200_v24  ;;  %v197_v27 = vmul.f32 %v460_v25, %v195_v23 }
  0x71   : > { %396 = vmatmul.mubr.msk.f32.vlgmr.msra.gmra.mxu0 %vm202_vm2, %v201_v26 }
 0x131   : > { %v272_v28 = vpop.f32.mrf.mxu0 }
 0x132   : > { %v276_v29 = vmul.f32 %v272_v28, %v197_v27 }
 0x133   : > { %v397_v30 = vpop.f32.mrf.mxu0 }
 0x134   : > { %v277_v31 = vadd.f32 %v276_v29, %v191_v19 }
 0x136   : > { %278 = vst.msk [vmem:[%s173_s17] sm:$0xf] %vm175_vm1, %v277_v31 }
 0x137   : > { %528 = shalt.err (!%p525_p0)
}
 0x138   : > { %s529_s27 = scalar_lea.hbm %s291_s20, 64  ;;  %s533_s4 = scalar_lea.hbm %s770_s2, 128 }
 0x139   : > { %p530_p5 = scmp.ne.s32.totalorder %s291_s20, %s529_s27  ;;  %p534_p1 = scmp.lt.s32.totalorder %s291_s20, %s770_s2 }
 0x13a   : > { %p535_p4 = scmp.lt.s32.totalorder %s533_s4, %s529_s27 }
 0x13b   : > { %p531_p9 = pnand %p530_p5, %p786_p3 }
 0x13c   : > { %p536_p6 = por %p535_p4, %p534_p1 }
 0x13d   : > { %p532_p12 = pneg %p531_p9 }
 0x13f   : > { %p537_p8 = pnand %p536_p6, %p532_p12 }
 0x141   : > { %540 = shalt.err (!%p537_p8)
}
 0x142   : > { %404 = dma.vmem_to_hbm [thread:$0]  (%p786_p3), %s294_s8, 64, %s291_s20, %s280_s23  }
 0x143 PF: > { %s305_s7 = sand.u32 1, %s571_s9   ;;  %p787_p11 = scmp.ne.s32.totalorder %s776_s16, 0 }
 0x144   : > { %p788_p7 = scmp.ge.s32.totalorder %s583_s12, 2  ;;  %s306_s14 = scalar_lea.sflag [#allocation4], %s305_s7 }
 0x146   : > { %p415_p10 = pnand %p788_p7, %p787_p11 }
 0x148   : > { %p416_p2 = pneg %p415_p10 }
 0x14a   : > { %566 = dma.done.wait (%p416_p2), %s306_s14, 64  }
 0x14b   : > { %568 = vsyncadd (%p416_p2), %s306_s14, 4294967232  ;;  %p16_p13 = scmp.ge.s32.totalorder %s661_s21, 4   ;;  %s789_s9 = smov %s575_s10 }
 0x14c   : > { %s790_s10 = smov %s579_s11  ;;  %s791_s11 = smov %s678_s29 }
 0x14d   : > { %s792_s12 = smov %s661_s21  ;;  %18 = sbr.rel (!%p16_p13) target bundleno = 6 (0x6), region = 77 }
 0x152   :  { %311 = vsyncpa [#allocation3], 1 }
 0x153   :  { %313 = vsyncpa [#allocation3 + $0x1], 1 }
 0x154   :  { %314 = vsyncpa [#allocation6], 1 }
 0x155   :  { %315 = vsyncpa [#allocation4], 1 }
 0x156   :  { %317 = vsyncpa [#allocation4 + $0x1], 1 }

</bundles_post_ra>
